<compile_context>
chip_gen: v6e
topology: v6e:2x2x1
jax: 0.10.0
libtpu: 0.0.40
codegen_flags: <defaults>
</compile_context>

<pallas_src>
import math
from functools import partial

import jax
import jax.numpy as jnp
from jax.experimental import pallas as pl
from jax.experimental.pallas import tpu as pltpu


def _round_up(x: int, m: int) -> int:
    return ((x + m - 1) // m) * m


def _sublane_pack(dtype) -> int:
    # Rows per fully-packed sublane group: 8 for 32-bit, 16 for 16-bit, 32 for 8-bit.
    itemsize = jnp.dtype(dtype).itemsize
    return 8 * max(1, 4 // itemsize)


def _modulation_kernel(w_ref, off_ref, out_ref):
    # Base-class semantics: out = weight * ones + offsets.  The registered
    # `ones` buffer is all-ones -> identity multiply elided (saves 1/4 of the
    # kernel's HBM traffic and a vld slot per result vreg).
    out_ref[...] = w_ref[...] + off_ref[...]


def _modulation_kernel_with_buffer(w_ref, ones_ref, off_ref, out_ref):
    # General path for subclasses whose modulation buffer is not provably ones.
    out_ref[...] = w_ref[...] * ones_ref[...] + off_ref[...]


@partial(jax.jit, static_argnames=("lanes", "min_blocks", "vmem_budget_bytes"))
def base_modulation_patch(weight: jax.Array, offsets: jax.Array, ones: jax.Array | None = None,
                          *, lanes: int = 128, min_blocks: int = 8,
                          vmem_budget_bytes: int = 12 * 1024 * 1024) -> jax.Array:
    """Apply the base modulation to a conv weight (G, C_out, C_in, K_x, K_y)."""
    assert weight.shape == offsets.shape, "weight/offsets shape mismatch"
    assert weight.dtype == offsets.dtype, "weight/offsets dtype mismatch"
    if ones is not None:
        assert ones.shape == weight.shape and ones.dtype == weight.dtype
    assert lanes % 128 == 0

    orig_shape = weight.shape
    dtype = weight.dtype
    itemsize = jnp.dtype(dtype).itemsize
    n = math.prod(orig_shape)

    # Metadata-only reshapes (no HBM traffic).
    flat_w = weight.reshape(-1)
    flat_o = offsets.reshape(-1)
    flat_b = ones.reshape(-1) if ones is not None else None

    tail = n % lanes
    main_n = n - tail
    rows = main_n // lanes

    parts = []
    if rows > 0:
        sub = _sublane_pack(dtype)
        n_streams = 3 if ones is None else 4  # inputs + output, each double-buffered
        max_tile_bytes = vmem_budget_bytes // (2 * n_streams)
        max_block_rows = max(sub, (max_tile_bytes // (lanes * itemsize)) // sub * sub)

        # Target >= min_blocks grid steps so the pipeline has something to
        # overlap and the "parallel" axis shards across v7x's two TensorCores.
        desired = _round_up(max(pl.cdiv(rows, min_blocks), 1), sub)
        block_rows = min(desired, max_block_rows)
        if block_rows >= rows:
            block_rows = rows  # single full-extent block (always a legal block shape)
        grid = (pl.cdiv(rows, block_rows),)  # partial edge block handled by Pallas

        def to_slab(x):
            # Copy-free when tail == 0; otherwise a prefix slice feeds the kernel.
            return (x if tail == 0 else x[:main_n]).reshape(rows, lanes)

        if ones is None:
            kernel = _modulation_kernel
            operands = (to_slab(flat_w), to_slab(flat_o))
            flops = main_n
        else:
            kernel = _modulation_kernel_with_buffer
            operands = (to_slab(flat_w), to_slab(flat_b), to_slab(flat_o))
            flops = 2 * main_n

        spec = pl.BlockSpec((block_rows, lanes), lambda i: (i, 0))

        # NOTE: no input_output_aliases — aliasing the caller's weight without
        # donation would force a defensive copy and give the bytes back.
        main_out = pl.pallas_call(
            kernel,
            out_shape=jax.ShapeDtypeStruct((rows, lanes), dtype),
            grid=grid,
            in_specs=[spec] * len(operands),
            out_specs=spec,
            compiler_params=pltpu.CompilerParams(dimension_semantics=("parallel",)),
            cost_estimate=pl.CostEstimate(
                flops=flops,
                transcendentals=0,
                bytes_accessed=(len(operands) + 1) * main_n * itemsize,
            ),
        )(*operands)
        parts.append(main_out.reshape(-1))

    if tail:
        # < one vreg of leftover elements: plain jnp (fused by XLA) is the right call.
        w_t, o_t = flat_w[main_n:], flat_o[main_n:]
        t = (w_t + o_t) if ones is None else (w_t * flat_b[main_n:] + o_t)
        parts.append(t)

    out_flat = parts[0] if len(parts) == 1 else jnp.concatenate(parts)
    return out_flat.reshape(orig_shape)


if __name__ == "__main__":
    # Small shapes consistent with the module's __init__ unpacking:
    # conv_weight.shape = (_, c_out, c_in, k_x, k_y)
    key = jax.random.PRNGKey(0)
    k_w, k_off, k_w2, k_off2 = jax.random.split(key, 4)

    # Case 1: base-class semantics (all-ones buffer elided), tail path exercised
    # (576 elements -> 4 full 128-lane rows + 64-element tail).
    shape = (2, 8, 4, 3, 3)
    conv_weight = jax.random.normal(k_w, shape, dtype=jnp.float32) * 0.1
    ones_buf = jnp.ones(shape, dtype=jnp.float32)   # == register_buffer('ones', ...)
    offsets = jax.random.normal(k_off, shape, dtype=jnp.float32) * 0.01

    out = jax.block_until_ready(base_modulation_patch(conv_weight, offsets))
    ref = conv_weight * ones_buf + offsets
    assert out.shape == shape and out.dtype == jnp.float32
    assert jnp.allclose(out, ref, atol=1e-6, rtol=1e-6)

    # Case 2: explicit (non-unit) modulation buffer streamed through the kernel,
    # copy-free wrapper (4608 elements = 36 * 128, no tail), multi-block grid.
    shape2 = (4, 16, 8, 3, 3)
    w2 = jax.random.normal(k_w2, shape2, dtype=jnp.float32)
    o2 = jax.random.normal(k_off2, shape2, dtype=jnp.float32)
    buf2 = jnp.full(shape2, 0.5, dtype=jnp.float32)

    out2 = jax.block_until_ready(base_modulation_patch(w2, o2, buf2))
    assert jnp.allclose(out2, w2 * buf2 + o2, atol=1e-6, rtol=1e-6)

    print("KERNEL_OK")
</pallas_src>

<mosaic_0001>
module attributes {stable_mosaic.version = 11 : i64} {
  func.func @_modulation_kernel(%arg0: i32, %arg1: memref<4x128xf32, #tpu.memory_space<vmem>>, %arg2: memref<4x128xf32, #tpu.memory_space<vmem>>, %arg3: memref<4x128xf32, #tpu.memory_space<vmem>>) attributes {dimension_semantics = [#tpu.dimension_semantics<parallel>], iteration_bounds = array<i64: 1>, scalar_prefetch = 0 : i64, scratch_operands = 0 : i64, tpu.core_type = #tpu.core_type<tc>, window_params = [{transform_indices = @transform_0, window_bounds = array<i64: 4, 128>}, {transform_indices = @transform_1, window_bounds = array<i64: 4, 128>}, {transform_indices = @transform_2, window_bounds = array<i64: 4, 128>}]} {
    %c0 = arith.constant 0 : index
    %c0_0 = arith.constant 0 : index
    %0 = vector.load %arg1[%c0, %c0_0] : memref<4x128xf32, #tpu.memory_space<vmem>>, vector<4x128xf32>
    %c0_1 = arith.constant 0 : index
    %c0_2 = arith.constant 0 : index
    %1 = vector.load %arg2[%c0_1, %c0_2] : memref<4x128xf32, #tpu.memory_space<vmem>>, vector<4x128xf32>
    %2 = arith.addf %0, %1 : vector<4x128xf32>
    %c0_3 = arith.constant 0 : index
    %c0_4 = arith.constant 0 : index
    %3 = vector.load %arg3[%c0_3, %c0_4] : memref<4x128xf32, #tpu.memory_space<vmem>>, vector<4x128xf32>
    tpu.vector_store %arg3[%c0_3, %c0_4], %2 {strides = array<i32>} : memref<4x128xf32, #tpu.memory_space<vmem>>, vector<4x128xf32>,
    return
  }
  func.func @transform_0(%arg0: i32) -> (i32, i32) {
    %c0_i32 = arith.constant 0 : i32
    %c0_i32_0 = arith.constant 0 : i32
    return %arg0, %c0_i32 : i32, i32
  }
  func.func @transform_1(%arg0: i32) -> (i32, i32) {
    %c0_i32 = arith.constant 0 : i32
    %c0_i32_0 = arith.constant 0 : i32
    return %arg0, %c0_i32 : i32, i32
  }
  func.func @transform_2(%arg0: i32) -> (i32, i32) {
    %c0_i32 = arith.constant 0 : i32
    %c0_i32_0 = arith.constant 0 : i32
    return %arg0, %c0_i32 : i32, i32
  }
}

</mosaic_0001>

<bundles_post_ra>
// kernel: base_modulation_patch.1
= control target key start
LH: loop header
LB: loop body
LE: loop exit
PB: predicated region body
PF: predicated region fallthrough
CT: control target
= control target key end

     0   :  { %s43_s0 = inlined_call_operand.vmem [shape: f32[4,128], index: 0, kind: input, shape index: {}]   ;;  %s44_s1 = inlined_call_operand.vmem [shape: f32[4,128], index: 1, kind: input, shape index: {}]   ;;  %s45_s2 = inlined_call_operand.vmem [shape: f32[4,128], index: 2, kind: output, shape index: {}]  }
   0x1   :  { %v11_v0 = vld [vmem:[%s43_s0] sm:$0xf] }
   0x2   :  { %v12_v1 = vld [vmem:[%s44_s1] sm:$0xf] }
   0x3   :  { %v13_v2 = vadd.f32 %v12_v1, %v11_v0 }
   0x5   :  { %14 = vst [vmem:[%s45_s2] sm:$0xf] %v13_v2 }

</bundles_post_ra>
